<compile_context>
chip_gen: v7x
topology: tpu7x:2x2x1
jax: 0.10.0
libtpu: 0.0.40
codegen_flags: <defaults>
</compile_context>

<pallas_src>
import inspect
import math

import jax
import jax.numpy as jnp
from jax.experimental import pallas as pl
from jax.experimental.pallas import tpu as pltpu


def _round_up(x, m):
    return (x + m - 1) // m * m


def _cdiv(a, b):
    return -(-a // b)


def _supports_buffered():
    if not hasattr(pl, "Buffered"):
        return False
    try:
        return "pipeline_mode" in inspect.signature(pl.BlockSpec).parameters
    except (TypeError, ValueError):
        return False


_HAS_BUFFERED = _supports_buffered()


def _vmem_capacity_bytes():
    """Physical VMEM per TensorCore; conservative 64 MiB (v7x) fallback."""
    try:
        cap = getattr(pltpu.get_tpu_info(), "vmem_capacity_bytes", None)
        if cap:
            return int(cap)
    except Exception:  # pure feature probe — never masks kernel/compile errors
        pass
    return 64 << 20


def gated_fusion_kernel(x1_ref, x2_ref, w1a_ref, w1b_ref, b1_ref,
                        w2_ref, b2_ref, wo_ref, bo_ref, o_ref):
    # In-kernel bf16 cast (cheap VPU op hidden under the matmuls) instead of a
    # separate XLA pad/cast pass over HBM.
    x1 = x1_ref[...].astype(jnp.bfloat16)                 # [tm, D]
    x2 = x2_ref[...].astype(jnp.bfloat16)                 # [tm, D]

    # Gate hidden: ReLU(cat([x1, x2]) @ W1 + b1) expressed as two bf16 MXU
    # matmuls with f32 accumulation (mathematically identical to the concat).
    h = (jnp.dot(x1, w1a_ref[...], preferred_element_type=jnp.float32)
         + jnp.dot(x2, w1b_ref[...], preferred_element_type=jnp.float32)
         + b1_ref[...])                                    # [tm, D] f32
    h = jnp.maximum(h, 0.0)

    # Gate logit: Linear(D -> 1) as VPU multiply + XLU lane reduction (an N=1
    # matmul would waste the MXU); sigmoid runs on the EUP.
    logit = jnp.sum(h * w2_ref[...], axis=-1, keepdims=True) + b2_ref[0, 0]
    g = jax.nn.sigmoid(logit)                              # [tm, 1] f32

    # fused = g*x1 + (1-g)*x2 == x2 + g*(x1 - x2); bf16 VALU math
    # (native on v6e/v7x; emulated but correct on v5e).
    fused = x2 + g.astype(jnp.bfloat16) * (x1 - x2)        # [tm, D] bf16

    # Output projection: bf16 operands, f32 accumulation; stored unpadded.
    o_ref[...] = (jnp.dot(fused, wo_ref[...], preferred_element_type=jnp.float32)
                  + bo_ref[...]).astype(o_ref.dtype)


def _vmem_need_bytes(tm, d, out_dim, weight_bufs):
    wbytes = weight_bufs * (2 * d * d * 2 + d * out_dim * 2   # w1a, w1b, wo (bf16)
                            + 2 * d * 4 + out_dim * 4)        # b1, w2, bo (f32)
    act = 2 * 2 * tm * d * 4           # x1, x2 f32 tiles, double-buffered
    outb = 2 * tm * out_dim * 4        # output tile f32, double-buffered
    interm = 4 * tm * d * 4            # h (f32), fused/diff (bf16), compiler slack
    return wbytes + act + outb + interm


def _choose_tile_m(rows, d, out_dim, tile_m, vmem_budget, weight_bufs):
    if rows <= 16:
        return max(rows, 1)            # single full-height block
    tm = min(_round_up(tile_m, 128), _round_up(rows, 128))
    if _cdiv(rows, tm) < 2:            # give both v7x TensorCores work
        tm = max(16, _round_up(_cdiv(rows, 2), 8))
    while tm > 16 and _vmem_need_bytes(tm, d, out_dim, weight_bufs) > vmem_budget:
        tm = max(16, _round_up(tm // 2, 8))
    return tm


def gated_fusion(x1, x2, params, *, tile_m=512):
    """x1, x2: [..., D]. Returns [..., output_dim] in x1.dtype."""
    w1a, w1b, b1, w2, b2, wo, bo = params
    d = x1.shape[-1]
    out_dim = wo.shape[-1]
    lead = x1.shape[:-1]
    rows = int(math.prod(lead)) if lead else 1

    # Free reshapes — no pad / pre-cast pre-pass over HBM.
    x1r = x1.reshape(rows, d)
    x2r = x2.reshape(rows, d)

    # One-time (tiny) weight preparation: matmul weights -> bf16, vectors -> f32.
    w1a_b = w1a.astype(jnp.bfloat16)
    w1b_b = w1b.astype(jnp.bfloat16)
    wo_b = wo.astype(jnp.bfloat16)
    b1_r = b1.reshape(1, d).astype(jnp.float32)
    w2_r = w2.reshape(1, d).astype(jnp.float32)
    bo_r = bo.reshape(1, out_dim).astype(jnp.float32)
    b2_r = jnp.asarray(b2, jnp.float32).reshape(1, 1)      # SMEM scalar

    vmem_cap = _vmem_capacity_bytes()
    vmem_budget = vmem_cap - (8 << 20)                     # headroom below physical

    weight_bytes = 2 * d * d * 2 + d * out_dim * 2 + (2 * d + out_dim) * 4
    # Single-buffer resident weights only when it saves meaningful VMEM and the
    # installed jax exposes pipeline_mode / pl.Buffered (upfront feature check,
    # no try/except around pallas_call).
    single_buf_weights = _HAS_BUFFERED and weight_bytes > (2 << 20)
    weight_bufs = 1 if single_buf_weights else 2

    if vmem_cap <= (64 << 20) and d >= 1024:               # v7x: smaller row tile
        tile_m = min(tile_m, 256)
    tm = _choose_tile_m(rows, d, out_dim, tile_m, vmem_budget, weight_bufs)

    need = _vmem_need_bytes(tm, d, out_dim, weight_bufs)
    vmem_limit = int(min(vmem_budget, max(need + (4 << 20), 16 << 20)))

    grid = (_cdiv(rows, tm),)

    def resident_spec(arr):
        idx = lambda i: (0,) * arr.ndim                    # same block every step
        if single_buf_weights:
            return pl.BlockSpec(arr.shape, idx, pipeline_mode=pl.Buffered(1))
        return pl.BlockSpec(arr.shape, idx)

    row_spec = pl.BlockSpec((tm, d), lambda i: (i, 0))
    out_spec = pl.BlockSpec((tm, out_dim), lambda i: (i, 0))
    smem_spec = pl.BlockSpec(memory_space=pltpu.MemorySpace.SMEM)

    out = pl.pallas_call(
        gated_fusion_kernel,
        out_shape=jax.ShapeDtypeStruct((rows, out_dim), x1.dtype),
        grid_spec=pltpu.PrefetchScalarGridSpec(
            num_scalar_prefetch=0,
            grid=grid,
            in_specs=[row_spec, row_spec,
                      resident_spec(w1a_b), resident_spec(w1b_b),
                      resident_spec(b1_r), resident_spec(w2_r),
                      smem_spec,
                      resident_spec(wo_b), resident_spec(bo_r)],
            out_specs=out_spec,
        ),
        compiler_params=pltpu.CompilerParams(
            dimension_semantics=("parallel",),
            vmem_limit_bytes=vmem_limit),
    )(x1r, x2r, w1a_b, w1b_b, b1_r, w2_r, b2_r, wo_b, bo_r)

    return out.reshape(*lead, out_dim)


def init_params(key, input_dim, output_dim):
    """Deterministic synthetic params in [in, out] layout (W1 split into halves)."""
    ks = jax.random.split(key, 6)
    d = input_dim
    w1a = jax.random.normal(ks[0], (d, d), jnp.float32) * 0.05   # W1 half for x1
    w1b = jax.random.normal(ks[1], (d, d), jnp.float32) * 0.05   # W1 half for x2
    b1 = jax.random.normal(ks[2], (d,), jnp.float32) * 0.05
    w2 = jax.random.normal(ks[3], (d,), jnp.float32) * 0.05
    b2 = jax.random.normal(ks[4], (), jnp.float32) * 0.05
    wo = jax.random.normal(ks[5], (d, output_dim), jnp.float32) * 0.05
    bo = jnp.linspace(-0.1, 0.1, output_dim, dtype=jnp.float32)
    return (w1a, w1b, b1, w2, b2, wo, bo)


def gated_fusion_ref(x1, x2, params):
    """Pure-JAX f32 reference (mirrors the PyTorch forward)."""
    w1a, w1b, b1, w2, b2, wo, bo = params
    h = jnp.maximum(x1 @ w1a + x2 @ w1b + b1, 0.0)
    g = jax.nn.sigmoid(jnp.sum(h * w2, axis=-1, keepdims=True) + b2)
    fused = g * x1 + (1.0 - g) * x2
    return fused @ wo + bo


if __name__ == "__main__":
    key = jax.random.PRNGKey(0)
    k_x1, k_x2, k_p = jax.random.split(key, 3)

    batch, seq, input_dim, output_dim = 2, 8, 32, 16
    x1 = jax.random.normal(k_x1, (batch, seq, input_dim), jnp.float32)
    x2 = jax.random.normal(k_x2, (batch, seq, input_dim), jnp.float32)
    params = init_params(k_p, input_dim, output_dim)

    out = gated_fusion(x1, x2, params)
    out = jax.block_until_ready(out)

    ref = gated_fusion_ref(x1, x2, params)
    assert out.shape == (batch, seq, output_dim), out.shape
    max_err = float(jnp.max(jnp.abs(out - ref)))
    # bf16 MXU operands / bf16 fusion math vs pure-f32 reference.
    assert max_err < 3e-2, max_err

    print("KERNEL_OK")
</pallas_src>

<mosaic_0001>
module attributes {stable_mosaic.version = 11 : i64} {
  func.func @gated_fusion_kernel(%arg0: i32, %arg1: memref<16x32xf32, #tpu.memory_space<vmem>>, %arg2: memref<16x32xf32, #tpu.memory_space<vmem>>, %arg3: memref<32x32xbf16, #tpu.memory_space<vmem>>, %arg4: memref<32x32xbf16, #tpu.memory_space<vmem>>, %arg5: memref<1x32xf32, #tpu.memory_space<vmem>>, %arg6: memref<1x32xf32, #tpu.memory_space<vmem>>, %arg7: memref<1x1xf32, #tpu.memory_space<smem>>, %arg8: memref<32x16xbf16, #tpu.memory_space<vmem>>, %arg9: memref<1x16xf32, #tpu.memory_space<vmem>>, %arg10: memref<16x16xf32, #tpu.memory_space<vmem>>) attributes {dimension_semantics = [#tpu.dimension_semantics<parallel>], iteration_bounds = array<i64: 1>, scalar_prefetch = 0 : i64, scratch_operands = 0 : i64, tpu.core_type = #tpu.core_type<tc>, window_params = [{transform_indices = @transform_0, window_bounds = array<i64: 16, 32>}, {transform_indices = @transform_1, window_bounds = array<i64: 16, 32>}, {pipeline_mode = #tpu.pipeline_mode<synchronous>, transform_indices = @transform_2, window_bounds = array<i64: 32, 32>}, {pipeline_mode = #tpu.pipeline_mode<synchronous>, transform_indices = @transform_3, window_bounds = array<i64: 32, 32>}, {pipeline_mode = #tpu.pipeline_mode<synchronous>, transform_indices = @transform_4, window_bounds = array<i64: 1, 32>}, {pipeline_mode = #tpu.pipeline_mode<synchronous>, transform_indices = @transform_5, window_bounds = array<i64: 1, 32>}, {transform_indices = @transform_6, window_bounds = array<i64: 1, 1>}, {pipeline_mode = #tpu.pipeline_mode<synchronous>, transform_indices = @transform_7, window_bounds = array<i64: 32, 16>}, {pipeline_mode = #tpu.pipeline_mode<synchronous>, transform_indices = @transform_8, window_bounds = array<i64: 1, 16>}, {transform_indices = @transform_9, window_bounds = array<i64: 16, 16>}]} {
    %c0 = arith.constant 0 : index
    %c0_0 = arith.constant 0 : index
    %0 = vector.load %arg1[%c0, %c0_0] : memref<16x32xf32, #tpu.memory_space<vmem>>, vector<16x32xf32>
    %1 = arith.truncf %0 : vector<16x32xf32> to vector<16x32xbf16>
    %c0_1 = arith.constant 0 : index
    %c0_2 = arith.constant 0 : index
    %2 = vector.load %arg2[%c0_1, %c0_2] : memref<16x32xf32, #tpu.memory_space<vmem>>, vector<16x32xf32>
    %3 = arith.truncf %2 : vector<16x32xf32> to vector<16x32xbf16>
    %c0_3 = arith.constant 0 : index
    %c0_4 = arith.constant 0 : index
    %4 = vector.load %arg3[%c0_3, %c0_4] : memref<32x32xbf16, #tpu.memory_space<vmem>>, vector<32x32xbf16>
    %cst = arith.constant dense<0.000000e+00> : vector<16x32xf32>
    %5 = tpu.matmul %1, %4, %cst {dimension_numbers = #tpu.dot_dimension_numbers<[1], [0], [0], [1], [0, 0, 1, 1], [], []>} : vector<16x32xbf16>, vector<32x32xbf16>, vector<16x32xf32> -> vector<16x32xf32>
    %c0_5 = arith.constant 0 : index
    %c0_6 = arith.constant 0 : index
    %6 = vector.load %arg4[%c0_5, %c0_6] : memref<32x32xbf16, #tpu.memory_space<vmem>>, vector<32x32xbf16>
    %cst_7 = arith.constant dense<0.000000e+00> : vector<16x32xf32>
    %7 = tpu.matmul %3, %6, %cst_7 {dimension_numbers = #tpu.dot_dimension_numbers<[1], [0], [0], [1], [0, 0, 1, 1], [], []>} : vector<16x32xbf16>, vector<32x32xbf16>, vector<16x32xf32> -> vector<16x32xf32>
    %8 = arith.addf %5, %7 : vector<16x32xf32>
    %c0_8 = arith.constant 0 : index
    %c0_9 = arith.constant 0 : index
    %9 = vector.load %arg5[%c0_8, %c0_9] : memref<1x32xf32, #tpu.memory_space<vmem>>, vector<1x32xf32>
    %10 = vector.broadcast %9 : vector<1x32xf32> to vector<16x32xf32>
    %11 = arith.addf %8, %10 : vector<16x32xf32>
    %cst_10 = arith.constant 0.000000e+00 : f32
    %12 = vector.broadcast %cst_10 : f32 to vector<16x32xf32>
    %13 = arith.maximumf %11, %12 : vector<16x32xf32>
    %c0_11 = arith.constant 0 : index
    %c0_12 = arith.constant 0 : index
    %14 = vector.load %arg6[%c0_11, %c0_12] : memref<1x32xf32, #tpu.memory_space<vmem>>, vector<1x32xf32>
    %15 = vector.broadcast %14 : vector<1x32xf32> to vector<16x32xf32>
    %16 = arith.mulf %13, %15 : vector<16x32xf32>
    %cst_13 = arith.constant dense<0.000000e+00> : vector<16xf32>
    %17 = vector.multi_reduction <add>, %16, %cst_13 [1] : vector<16x32xf32> to vector<16xf32>
    %18 = vector.shape_cast %17 : vector<16xf32> to vector<16x1xf32>
    %c0_14 = arith.constant 0 : index
    %c0_15 = arith.constant 0 : index
    %19 = memref.load %arg7[%c0_14, %c0_15] : memref<1x1xf32, #tpu.memory_space<smem>>
    %20 = vector.broadcast %19 : f32 to vector<16x1xf32>
    %21 = arith.addf %18, %20 : vector<16x1xf32>
    %22 = arith.negf %21 : vector<16x1xf32>
    %23 = math.exp %22 : vector<16x1xf32>
    %cst_16 = arith.constant 1.000000e+00 : f32
    %24 = vector.broadcast %cst_16 : f32 to vector<16x1xf32>
    %25 = arith.addf %24, %23 : vector<16x1xf32>
    %26 = arith.divf %24, %25 : vector<16x1xf32>
    %27 = arith.truncf %26 : vector<16x1xf32> to vector<16x1xbf16>
    %28 = arith.subf %1, %3 : vector<16x32xbf16>
    %29 = vector.broadcast %27 : vector<16x1xbf16> to vector<16x32xbf16>
    %30 = arith.mulf %29, %28 : vector<16x32xbf16>
    %31 = arith.addf %3, %30 : vector<16x32xbf16>
    %c0_17 = arith.constant 0 : index
    %c0_18 = arith.constant 0 : index
    %32 = vector.load %arg8[%c0_17, %c0_18] : memref<32x16xbf16, #tpu.memory_space<vmem>>, vector<32x16xbf16>
    %cst_19 = arith.constant dense<0.000000e+00> : vector<16x16xf32>
    %33 = tpu.matmul %31, %32, %cst_19 {dimension_numbers = #tpu.dot_dimension_numbers<[1], [0], [0], [1], [0, 0, 1, 1], [], []>} : vector<16x32xbf16>, vector<32x16xbf16>, vector<16x16xf32> -> vector<16x16xf32>
    %c0_20 = arith.constant 0 : index
    %c0_21 = arith.constant 0 : index
    %34 = vector.load %arg9[%c0_20, %c0_21] : memref<1x16xf32, #tpu.memory_space<vmem>>, vector<1x16xf32>
    %35 = vector.broadcast %34 : vector<1x16xf32> to vector<16x16xf32>
    %36 = arith.addf %33, %35 : vector<16x16xf32>
    %c0_22 = arith.constant 0 : index
    %c0_23 = arith.constant 0 : index
    %37 = vector.load %arg10[%c0_22, %c0_23] : memref<16x16xf32, #tpu.memory_space<vmem>>, vector<16x16xf32>
    tpu.vector_store %arg10[%c0_22, %c0_23], %36 {strides = array<i32>} : memref<16x16xf32, #tpu.memory_space<vmem>>, vector<16x16xf32>,
    return
  }
  func.func @transform_0(%arg0: i32) -> (i32, i32) {
    %c0_i32 = arith.constant 0 : i32
    %c0_i32_0 = arith.constant 0 : i32
    return %arg0, %c0_i32 : i32, i32
  }
  func.func @transform_1(%arg0: i32) -> (i32, i32) {
    %c0_i32 = arith.constant 0 : i32
    %c0_i32_0 = arith.constant 0 : i32
    return %arg0, %c0_i32 : i32, i32
  }
  func.func @transform_2(%arg0: i32) -> (i32, i32) {
    %c0_i32 = arith.constant 0 : i32
    %c0_i32_0 = arith.constant 0 : i32
    %c0_i32_1 = arith.constant 0 : i32
    return %c0_i32, %c0_i32_0 : i32, i32
  }
  func.func @transform_3(%arg0: i32) -> (i32, i32) {
    %c0_i32 = arith.constant 0 : i32
    %c0_i32_0 = arith.constant 0 : i32
    %c0_i32_1 = arith.constant 0 : i32
    return %c0_i32, %c0_i32_0 : i32, i32
  }
  func.func @transform_4(%arg0: i32) -> (i32, i32) {
    %c0_i32 = arith.constant 0 : i32
    %c0_i32_0 = arith.constant 0 : i32
    %c0_i32_1 = arith.constant 0 : i32
    return %c0_i32, %c0_i32_0 : i32, i32
  }
  func.func @transform_5(%arg0: i32) -> (i32, i32) {
    %c0_i32 = arith.constant 0 : i32
    %c0_i32_0 = arith.constant 0 : i32
    %c0_i32_1 = arith.constant 0 : i32
    return %c0_i32, %c0_i32_0 : i32, i32
  }
  func.func @transform_6(%arg0: i32) -> (i32, i32) {
    %c0_i32 = arith.constant 0 : i32
    %c0_i32_0 = arith.constant 0 : i32
    %c0_i32_1 = arith.constant 0 : i32
    return %c0_i32, %c0_i32_0 : i32, i32
  }
  func.func @transform_7(%arg0: i32) -> (i32, i32) {
    %c0_i32 = arith.constant 0 : i32
    %c0_i32_0 = arith.constant 0 : i32
    %c0_i32_1 = arith.constant 0 : i32
    return %c0_i32, %c0_i32_0 : i32, i32
  }
  func.func @transform_8(%arg0: i32) -> (i32, i32) {
    %c0_i32 = arith.constant 0 : i32
    %c0_i32_0 = arith.constant 0 : i32
    %c0_i32_1 = arith.constant 0 : i32
    return %c0_i32, %c0_i32_0 : i32, i32
  }
  func.func @transform_9(%arg0: i32) -> (i32, i32) {
    %c0_i32 = arith.constant 0 : i32
    %c0_i32_0 = arith.constant 0 : i32
    return %arg0, %c0_i32 : i32, i32
  }
}

</mosaic_0001>

<bundles_post_ra>
// kernel: tpu_custom_call.1
= control target key start
LH: loop header
LB: loop body
LE: loop exit
PB: predicated region body
PF: predicated region fallthrough
CT: control target
= control target key end

     0   :  { %15 = vsyncpa [#allocation4], 0  ;;  %s605_s0 = inlined_call_operand.vmem [shape: f32[16,32], index: 0, kind: input, shape index: {}]   ;;  %s606_s1 = inlined_call_operand.hbm [shape: f32[16,32], index: 1, kind: input, shape index: {}]   ;;  %s607_s2 = inlined_call_operand.vmem [shape: bf16[32,32], index: 2, kind: input, shape index: {}]   ;;  %s608_s3 = inlined_call_operand.hbm [shape: bf16[32,32], index: 3, kind: input, shape index: {}]   ;;  %s609_s4 = inlined_call_operand.vmem [shape: f32[1,32], index: 4, kind: input, shape index: {}]   ;;  %s610_s5 = inlined_call_operand.vmem [shape: f32[1,32], index: 5, kind: input, shape index: {}]   ;;  %s611_s6 = inlined_call_operand.<no memory space> [shape: f32[1,1], index: 6, kind: input, shape index: {}]   ;;  %s612_s7 = inlined_call_operand.vmem [shape: bf16[32,16], index: 7, kind: input, shape index: {}]   ;;  %s613_s8 = inlined_call_operand.vmem [shape: f32[1,16], index: 8, kind: input, shape index: {}]   ;;  %s614_s9 = inlined_call_operand.hbm [shape: f32[16,16], index: 9, kind: output, shape index: {}]  }
   0x1   :  { %16 = vsyncpa [#allocation7], 0 }
   0x2   :  { %17 = vsyncpa [#allocation5], 0  ;;  %s466_s30 = smov [#allocation3]   ;;  %s394_s13 = scalar_lea.hbm %s606_s1, 256 }
   0x3   :  { %s25_s10 = sshll.u32 %s466_s30, 4  ;;  %p395_p0 = scmp.ne.s32.totalorder %s606_s1, %s394_s13  ;;  %s26_s10 = int_to_ptr.vmem [resolvable:$true] %s25_s10 }
   0x4   :  { %p398_p1 = scmp.lt.u32.totalorder %s394_s13, %s606_s1 }
   0x6   :  { %p400_p2 = pnand %p398_p1, %p395_p0 }
   0x8   :  { %403 = shalt.err (!%p400_p2)
}
   0x9   :  { %s404_s18 = scalar_lea.vmem %s26_s10, 256  ;;  %p409_p4 = scmp.lt.s32.totalorder %s26_s10, %s26_s10 }
   0xa   :  { %p405_p3 = scmp.ne.s32.totalorder %s26_s10, %s404_s18  ;;  %p410_p5 = scmp.lt.s32.totalorder %s404_s18, %s404_s18 }
   0xc   :  { %p411_p6 = por %p410_p5, %p409_p4 }
   0xe   :  { %p412_p7 = pnand %p411_p6, %p405_p3 }
  0x10   :  { %415 = shalt.err (!%p412_p7)
}
  0x11   :  { %s467_s19 = smov 128   ;;  %s468_s20 = smov 8  }
  0x12   :  { %31 = dma.hbm_to_vmem [thread:$0]  %s606_s1, 256, %s26_s10, [#allocation4], %s467_s19, %s467_s19, %s468_s20  }
  0x13   :  { %s469_s23 = smov [#allocation6]   ;;  %s416_s27 = scalar_lea.hbm %s608_s3, 256 }
  0x14   :  { %s39_s24 = sshll.u32 %s469_s23, 4  ;;  %p417_p8 = scmp.ne.s32.totalorder %s608_s3, %s416_s27  ;;  %s40_s24 = int_to_ptr.vmem [resolvable:$true] %s39_s24 }
  0x15   :  { %p420_p9 = scmp.lt.u32.totalorder %s416_s27, %s608_s3 }
  0x17   :  { %p422_p10 = pnand %p420_p9, %p417_p8 }
  0x19   :  { %425 = shalt.err (!%p422_p10)
}
  0x1a   :  { %s426_s12 = scalar_lea.vmem %s40_s24, 256  ;;  %p431_p12 = scmp.lt.s32.totalorder %s40_s24, %s40_s24 }
  0x1b   :  { %p427_p11 = scmp.ne.s32.totalorder %s40_s24, %s426_s12  ;;  %p432_p13 = scmp.lt.s32.totalorder %s426_s12, %s426_s12 }
  0x1d   :  { %p433_p0 = por %p432_p13, %p431_p12 }
  0x1f   :  { %p434_p1 = pnand %p433_p0, %p427_p11 }
  0x21   :  { %437 = shalt.err (!%p434_p1)
}
  0x22   :  { %s470_s1 = smov 64   ;;  %s471_s10 = smov 4  }
  0x23   :  { %45 = dma.hbm_to_vmem [thread:$0]  %s608_s3, 256, %s40_s24, [#allocation7], %s470_s1, %s470_s1, %s471_s10  }
  0x24   :  { %460 = dma.done.wait [#allocation4], 256  }
  0x25   :  { %461 = vsyncadd [#allocation4], 4294967040 }
  0x26   :  { %462 = dma.done.wait [#allocation7], 256  }
  0x27   :  { %463 = vsyncadd [#allocation7], 4294967040  ;;  %v472_v0 = vmov 0.0   ;;  %vm473_vm0 = vmmov 0   ;;  %v380_v1 = vld [vmem:[#allocation6] sm:$0xff]   ;;  %v381_v2 = vld [vmem:[%s607_s2] sm:$0xff]   ;;  %v217_v33 = vstv %s611_s6 }
  0x28   :  { %347 = vmatprep.subr.bf16.mxu0 %v472_v0  ;;  %355 = vmatprep.subr.bf16.mxu1 %v472_v0  ;;  %v382_v3 = vld [vmem:[#allocation6 + $0x8] sm:$0xff]   ;;  %v383_v4 = vld [vmem:[%s607_s2 + $0x8] sm:$0xff]   ;;  %v66_v5 = vld [vmem:[#allocation3] sm:$0xff]  ;;  %vm89_vm1 = vcmask 261120   ;;  %vm303_vm2 = vcmask 130048   ;;  %s474_s30 = smov [#allocation8]  }
  0x29   :  { %351 = vmatprep.mubr.msk.bf16.mxu0 %vm473_vm0, %v472_v0  ;;  %359 = vmatprep.mubr.msk.bf16.mxu1 %vm473_vm0, %v472_v0  ;;  %v67_v6 = vld [vmem:[#allocation3 + $0x8] sm:$0xff]  ;;  %v63_v7 = vld [vmem:[%s605_s0] sm:$0xff]  ;;  %s311_s11 = sshll.u32 %s474_s30, 4  ;;  %s312_s11 = int_to_ptr.vmem [resolvable:$true] %s311_s11 }
  0x2a   :  { %348 = vmatpush3.bf16.msra.mxu0 %v380_v1  ;;  %356 = vmatpush3.bf16.msra.mxu1 %v381_v2  ;;  %v68_v8 = vpack.c.bf16 %v67_v6, %v66_v5  ;;  %v64_v9 = vld [vmem:[%s605_s0 + $0x8] sm:$0xff]  ;;  %v330_v13 = vld [vmem:[%s609_s4] ss:$0 sm:$0xff]  ;;  %s438_s12 = scalar_lea.vmem %s312_s11, 256  ;;  %p443_p3 = scmp.lt.s32.totalorder %s312_s11, %s312_s11 }
  0x2b   :  { %349 = vmatprep.subr.bf16.mxu0 %v472_v0  ;;  %357 = vmatprep.subr.bf16.mxu1 %v472_v0  ;;  %v65_v10 = vpack.c.bf16 %v64_v9, %v63_v7  ;;  %v331_v23 = vld [vmem:[%s610_s5] ss:$0 sm:$0xff]  ;;  %v385_v32 = vld [vmem:[%s612_s7 + $0x8] sm:$0xff]   ;;  %p439_p2 = scmp.ne.s32.totalorder %s312_s11, %s438_s12  ;;  %p444_p4 = scmp.lt.s32.totalorder %s438_s12, %s438_s12 }
  0x2c   :  { %v384_v31 = vld [vmem:[%s612_s7] sm:$0xff]  }
  0x2d   :  { %v233_v45 = vsub.bf16 %v65_v10, %v68_v8  ;;  %v334_v50 = vld [vmem:[%s613_s8] ss:$0 sm:$0xff]  ;;  %p445_p5 = por %p444_p4, %p443_p3 }
  0x2e   :  { %350 = vmatpush3.bf16.msra.mxu0 %v382_v3  ;;  %358 = vmatpush3.bf16.msra.mxu1 %v383_v4 }
  0x2f   :  { %363 = vmatprep.subr.bf16.mxu0 %v472_v0  ;;  %p446_p6 = pnand %p445_p5, %p439_p2 }
  0x31   :  { %352 = vmatmul.mubr.msk.bf16.vlgmr.msra.gmra.mrb[0].mxu0 %vm89_vm1, %v68_v8  ;;  %360 = vmatmul.mubr.msk.bf16.vlgmr.msra.gmra.mrb[0].mxu1 %vm89_vm1, %v65_v10 }
  0x32   :  { %367 = vmatprep.mubr.msk.bf16.mxu0 %vm473_vm0, %v472_v0  ;;  %364 = vmatpush3.bf16.msra.mxu0 %v384_v31 }
  0x33   :  { %365 = vmatprep.subr.bf16.mxu0 %v472_v0 }
  0x36   :  { %366 = vmatpush3.bf16.msra.mxu0 %v385_v32 }
 0x104   :  { %v127_v11 = vpop.f32.mrb[0].mxu0  ;;  %v183_v12 = vpop.f32.mrb[0].mxu1 }
 0x105   :  { %v353_v14 = vpop.f32.mrb[1].mxu0  ;;  %v184_v15 = vadd.f32 %v183_v12, %v127_v11  ;;  %v361_v16 = vpop.f32.mrb[1].mxu1 }
 0x106   :  { %v130_v17 = vpop.f32.mrb[2].mxu0  ;;  %v186_v18 = vpop.f32.mrb[2].mxu1 }
 0x107   :  { %v354_v19 = vpop.f32.mrb[3].mxu0  ;;  %v197_v20 = vadd.f32 %v330_v13, %v184_v15  ;;  %v187_v21 = vadd.f32 %v186_v18, %v130_v17  ;;  %v362_v22 = vpop.f32.mrb[3].mxu1 }
 0x109   :  { %v199_v24 = vmax.f32 %v197_v20, 0.0  ;;  %v198_v25 = vadd.f32 %v330_v13, %v187_v21 }
 0x10b   :  { %v200_v26 = vmax.f32 %v198_v25, 0.0  ;;  %v208_v27 = vmul.f32 %v331_v23, %v199_v24 }
 0x10d   :  { %v210_v28 = vsel %vm89_vm1, %v208_v27, 0.0  ;;  %v209_v29 = vmul.f32 %v331_v23, %v200_v26 }
 0x10e   :  { %211 = vadd.xlane.f32.xlu0 %v210_v28 }
 0x10f   :  { %v213_v30 = vsel %vm89_vm1, %v209_v29, 0.0 }
 0x112   :  { %214 = vadd.xlane.f32.xlu0 %v213_v30 }
 0x19b   :  { %v212_v34 = vpop.xlane.xlu0 %211 }
 0x19c   :  { %v218_v35 = vadd.f32 %v217_v33, %v212_v34 }
 0x19e   :  { %v332_v36 = vmul.f32 -1.442695, %v218_v35 }
 0x19f   :  { %v215_v37 = vpop.xlane.xlu0 %214 }
 0x1a0   :  { %386 = vpow2.f32 %v332_v36  ;;  %v219_v38 = vadd.f32 %v217_v33, %v215_v37 }
 0x1a2   :  { %v333_v39 = vmul.f32 -1.442695, %v219_v38 }
 0x1a4   :  { %388 = vpow2.f32 %v333_v39 }
 0x1aa   :  { %v387_v40 = vpop.eup %386 }
 0x1ab   :  { %v226_v41 = vadd.f32 1.0, %v387_v40 }
 0x1ad   :  { %390 = vrcp.f32 %v226_v41 }
 0x1ae   :  { %v389_v42 = vpop.eup %388 }
 0x1af   :  { %v227_v43 = vadd.f32 1.0, %v389_v42 }
 0x1b1   :  { %392 = vrcp.f32 %v227_v43 }
 0x1b7   :  { %v391_v44 = vpop.eup %390 }
 0x1bb   :  { %v393_v46 = vpop.eup %392 }
 0x1bc   :  { %v232_v47 = vpack.c.bf16 %v393_v46, %v391_v44 }
 0x1be   :  { %v234_v48 = vmul.bf16 %v233_v45, %v232_v47 }
 0x1c0   :  { %v235_v49 = vadd.bf16 %v234_v48, %v68_v8 }
 0x1c2   :  { %368 = vmatmul.mubr.msk.bf16.vlgmr.msra.gmra.mrb[4].mxu0 %vm89_vm1, %v235_v49 }
 0x295   :  { %v296_v51 = vpop.f32.mrb[4].mxu0 }
 0x296   :  { %v297_v52 = vadd.f32 %v334_v50, %v296_v51  ;;  %v369_v53 = vpop.f32.mrb[5].mxu0 }
 0x297   :  { %v299_v54 = vpop.f32.mrb[6].mxu0 }
 0x298   :  { %v300_v55 = vadd.f32 %v334_v50, %v299_v54  ;;  %v370_v56 = vpop.f32.mrb[7].mxu0  ;;  %304 = vst.msk [vmem:[#allocation8] sm:$0xff] %vm303_vm2, %v297_v52 }
 0x29a   :  { %305 = vst.msk [vmem:[#allocation8 + $0x8] sm:$0xff] %vm303_vm2, %v300_v55 }
 0x29b   :  { %449 = shalt.err (!%p446_p6)
}
 0x29c   :  { %s450_s10 = scalar_lea.hbm %s614_s9, 256 }
 0x29d   :  { %p451_p7 = scmp.ne.s32.totalorder %s614_s9, %s450_s10  ;;  %p454_p8 = scmp.lt.u32.totalorder %s450_s10, %s614_s9 }
 0x29f   :  { %p456_p9 = pnand %p454_p8, %p451_p7 }
 0x2a1   :  { %459 = shalt.err (!%p456_p9)
}
 0x2a2   :  { %317 = dma.vmem_to_hbm [thread:$0]  %s312_s11, 256, %s614_s9, [#allocation5], %s467_s19, %s467_s19, %s468_s20  }
 0x2a3   :  { %464 = dma.done.wait [#allocation5], 256  }
 0x2a4   :  { %465 = vsyncadd [#allocation5], 4294967040 }
 0x2a5   :  { %321 = vsyncpa [#allocation4], 1 }
 0x2a6   :  { %322 = vsyncpa [#allocation7], 1 }
 0x2a7   :  { %323 = vsyncpa [#allocation5], 1 }

</bundles_post_ra>
